<compile_context>
chip_gen: v7x
topology: tpu7x:2x2x1
jax: 0.10.0
libtpu: 0.0.40
codegen_flags: <defaults>
</compile_context>

<pallas_src>
import functools

import jax
import jax.numpy as jnp
from jax import lax
from jax.experimental import pallas as pl
from jax.experimental.pallas import tpu as pltpu


# ----------------------------------------------------------------------------
# pltpu.roll convention (pinned once with a tiny probe kernel)
# ----------------------------------------------------------------------------
_ROLL_FOLLOWS_NUMPY = None


def _roll_follows_numpy_convention() -> bool:
    """pltpu.roll follows jnp.roll (result[i] = x[(i - shift) % n]) in current
    JAX.  Verify once with a ~microsecond probe kernel so a sign-convention
    change in a future jax/Mosaic release cannot silently corrupt the conv."""
    global _ROLL_FOLLOWS_NUMPY
    if _ROLL_FOLLOWS_NUMPY is None:
        def probe(x_ref, o_ref):
            o_ref[...] = pltpu.roll(x_ref[...], shift=1, axis=0)

        x = jnp.broadcast_to(jnp.arange(8, dtype=jnp.float32)[:, None], (8, 128))
        y = pl.pallas_call(
            probe, out_shape=jax.ShapeDtypeStruct((8, 128), jnp.float32))(x)
        _ROLL_FOLLOWS_NUMPY = bool(y[0, 0] == 7.0)  # np.roll: result[0] = x[-1]
    return _ROLL_FOLLOWS_NUMPY


def _roll_left_shifts(period: int) -> tuple[int, int, int]:
    """Shift args for pltpu.roll(axis=<sublane>) that realise a LEFT shift by
    0 / 1 / 2 elements, i.e. result[i] = x[(i + k) % period]."""
    if _roll_follows_numpy_convention():
        return (0, (period - 1) % period, (period - 2) % period)
    return (0, 1 % period, 2 % period)


# ----------------------------------------------------------------------------
# kernel
# ----------------------------------------------------------------------------
def repconv_kernel(x_hbm, w_ref, b_ref, o_ref, xwin_ref, copy_sem, *, roll_shifts):
    """One (batch, H-tile) grid step.

    x_hbm   : (N, H+2, Wp, C1p)  zero-padded image, left in HBM (pl.ANY)
    w_ref   : (3, 3*C1p, C2p)    per-ky BN-folded weight slabs (kx-major on K;
                                 the 1x1 branch is folded into the centre tap)
    b_ref   : (1, C2p)           folded bias (float32)
    o_ref   : (1, TH, Wp, C2p)   padded output tile (W / channel pad stripped
                                 by the wrapper)
    xwin_ref: (TH+2, Wp, C1p)    VMEM halo-window scratch
    copy_sem: DMA semaphore(s) for the halo-window copy
    """
    _, th, wp, c2p = o_ref.shape
    c1p = x_hbm.shape[-1]
    n = pl.program_id(0)
    t = pl.program_id(1)

    # Fetch this step's (TH+2)-row halo window straight from HBM.  Each step
    # is self-contained, so both grid axes can stay "parallel" (megacore-safe)
    # and per-core VMEM is bounded by the tile, not the whole image.
    # TODO(synk): cross-step double-buffering of the halo window would hide
    # this DMA behind the previous step's compute; it needs megacore-safe
    # prefetch bookkeeping, so the copy is left synchronous here.
    row0 = pl.multiple_of(t * th, th)
    cp = pltpu.make_async_copy(
        x_hbm.at[n, pl.ds(row0, th + 2), :, :], xwin_ref, copy_sem.at[0])
    cp.start()
    cp.wait()

    m = th * wp
    acc = None
    for ky in range(3):
        # One TH-row slab for this ky; rows merge into the sublane axis
        # tile-aligned because Wp % 8 == 0.
        slab = xwin_ref[pl.ds(ky, th), :, :].reshape(m, c1p)
        # kx = 0,1,2 window shifts as sublane rotations (XLU slot, idle here).
        # Wrapped elements only land in the discarded W-padding columns.
        shifted = [slab if s == 0 else pltpu.roll(slab, shift=s, axis=0)
                   for s in roll_shifts]
        # Fuse the 3 kx taps along the contraction dim: one
        # (m, 3*C1p) @ (3*C1p, C2p) MXU matmul per ky, f32 accumulation.
        a = jnp.concatenate(shifted, axis=-1)
        part = jnp.dot(a, w_ref[ky], preferred_element_type=jnp.float32)
        acc = part if acc is None else acc + part

    # f32 epilogue: bias + SiLU, then a single lane/sublane-dense store.
    y = acc + b_ref[0]
    y = y * jax.nn.sigmoid(y)
    o_ref[0] = y.reshape(th, wp, c2p).astype(o_ref.dtype)
    # TODO(synk): grouped conv (g > 1) is not implemented; default RepConv uses g=1.


# ----------------------------------------------------------------------------
# wrapper
# ----------------------------------------------------------------------------
def _round_up(x: int, m: int) -> int:
    return -(-x // m) * m


def _pick_tile_h(h: int, max_tile: int = 16) -> int:
    for d in range(min(h, max_tile), 0, -1):
        if h % d == 0:
            return d
    return 1


def repconv_forward(x_nchw, w3_oihw, w1_oihw, bn3, bn1, *, bn_id=None,
                    compute_dtype=jnp.bfloat16, tile_h=16):
    """RepConv forward (k=3, s=1, p=1, g=1, d=1), eval-mode BatchNorm.

    x_nchw : (N, C1, H, W) float32
    w3_oihw: (C2, C1, 3, 3) conv1 weight     w1_oihw: (C2, C1, 1, 1) conv2 weight
    bn3/bn1: dict(gamma, beta, mean, var, eps) for each branch's BatchNorm2d
    bn_id  : optional identity-branch BatchNorm2d params (RepConv bn=True path,
             requires c1 == c2)
    compute_dtype: MXU operand dtype.  bf16 (default) is the fast path on
             v5e/v6e/v7x; accumulation, bias and SiLU stay f32 either way, so
             expect ~bf16-level (≈1e-2) absolute error vs the f32 reference.
    returns: (N, C2, H, W) float32
    """
    N, C1, H, W = x_nchw.shape
    C2, c1w, kh, kw = w3_oihw.shape
    assert (c1w, kh, kw) == (C1, 3, 3)
    assert w1_oihw.shape == (C2, C1, 1, 1)

    # ---- RepVGG reparameterization (wrapper-side glue, runs once) ----------
    def bn_affine(p):
        inv_std = lax.rsqrt(p["var"] + p["eps"])
        scale = p["gamma"] * inv_std
        return scale, p["beta"] - p["mean"] * scale

    s3, b3 = bn_affine(bn3)
    s1, b1 = bn_affine(bn1)
    w3f = w3_oihw * s3[:, None, None, None]
    w1f = w1_oihw[:, :, 0, 0] * s1[:, None]
    w3f = w3f.at[:, :, 1, 1].add(w1f)              # fold 1x1 into centre tap
    bias_vec = b3 + b1
    if bn_id is not None:                            # identity-BN branch (bn=True)
        assert C1 == C2, "identity BN branch requires c1 == c2"
        si, bi = bn_affine(bn_id)
        ch = jnp.arange(C2)
        w3f = w3f.at[ch, ch, 1, 1].add(si)
        bias_vec = bias_vec + bi

    # ---- channel padding: lane-dense MXU operands and unmasked stores ------
    C1p = _round_up(C1, 128)
    C2p = _round_up(C2, 128)
    # per-ky weight slabs, kx-major along K: (3, 3*C1p, C2p)
    wk = jnp.transpose(w3f, (2, 3, 1, 0))                       # (ky, kx, C1, C2)
    wk = jnp.pad(wk, ((0, 0), (0, 0), (0, C1p - C1), (0, C2p - C2)))
    w_taps = wk.reshape(3, 3 * C1p, C2p).astype(compute_dtype)
    bias = jnp.pad(bias_vec, (0, C2p - C2)).astype(jnp.float32).reshape(1, C2p)

    # ---- layout: NCHW -> NHWC (channels on lanes), halo pad, single cast ---
    TH = _pick_tile_h(H, tile_h)
    Wp = _round_up(W + 2, 8)
    assert Wp >= W + 2, (Wp, W)   # roll wrap must land in discarded padding cols
    x = jnp.transpose(x_nchw, (0, 2, 3, 1))
    xp = jnp.pad(x, ((0, 0), (1, 1), (1, Wp - W - 1), (0, C1p - C1)))
    xp = xp.astype(compute_dtype)  # cast ONCE here; bf16 halves DMA bytes
    # TODO(synk): the NCHW<->NHWC transposes + pad are extra HBM passes; in an
    # NHWC end-to-end pipeline feed the kernel directly and fold the halo in.

    roll_shifts = _roll_left_shifts(TH * Wp)
    kernel = functools.partial(repconv_kernel, roll_shifts=roll_shifts)

    # ---- explicit VMEM budget derived from the actual block sizes ----------
    isz = xp.dtype.itemsize
    est = ((TH + 2) * Wp * C1p * isz              # halo-window scratch
           + 2 * 9 * C1p * C2p * isz              # weight slabs (double-buffered)
           + 2 * C2p * 4                          # bias
           + 2 * TH * Wp * C2p * 4                # output tile (double-buffered)
           + 4 * TH * Wp * 3 * C1p * isz          # slab + rolls + concat operand
           + 2 * TH * Wp * C2p * 4)               # f32 accumulator / epilogue
    vmem_limit = int(min(64 << 20, max(32 << 20, 2 * est)))

    cost = pl.CostEstimate(
        flops=int(2 * N * H * Wp * 9 * C1p * C2p),
        transcendentals=int(N * H * Wp * C2p),
        bytes_accessed=int(xp.size * isz + w_taps.size * isz
                           + bias.size * 4 + N * H * Wp * C2p * 4),
    )

    out_nhwc = pl.pallas_call(
        kernel,
        out_shape=jax.ShapeDtypeStruct((N, H, Wp, C2p), jnp.float32),
        grid_spec=pltpu.PrefetchScalarGridSpec(
            num_scalar_prefetch=0,
            grid=(N, H // TH),
            in_specs=[
                pl.BlockSpec(memory_space=pl.ANY),             # image stays in HBM
                pl.BlockSpec((3, 3 * C1p, C2p), lambda n, t: (0, 0, 0)),
                pl.BlockSpec((1, C2p), lambda n, t: (0, 0)),
            ],
            out_specs=pl.BlockSpec((1, TH, Wp, C2p), lambda n, t: (n, t, 0, 0)),
            scratch_shapes=[
                pltpu.VMEM((TH + 2, Wp, C1p), compute_dtype),  # halo window
                pltpu.SemaphoreType.DMA((1,)),
            ],
        ),
        compiler_params=pltpu.CompilerParams(
            dimension_semantics=("parallel", "parallel"),
            vmem_limit_bytes=vmem_limit),
        cost_estimate=cost,
    )(xp, w_taps, bias)

    # strip W / channel padding, back to NCHW
    return jnp.transpose(out_nhwc[:, :, :W, :C2], (0, 3, 1, 2))


# ----------------------------------------------------------------------------
# plain-JAX reference (unfused — ground truth matching PyTorch eval mode)
# ----------------------------------------------------------------------------
def repconv_reference(x_nchw, w3_oihw, w1_oihw, bn3, bn1):
    def bn(y, p):
        inv_std = 1.0 / jnp.sqrt(p["var"] + p["eps"])
        scale = (p["gamma"] * inv_std)[None, :, None, None]
        shift = (p["beta"] - p["mean"] * p["gamma"] * inv_std)[None, :, None, None]
        return y * scale + shift

    y3 = lax.conv_general_dilated(
        x_nchw, w3_oihw, window_strides=(1, 1), padding=((1, 1), (1, 1)),
        dimension_numbers=("NCHW", "OIHW", "NCHW"))
    y1 = lax.conv_general_dilated(
        x_nchw, w1_oihw, window_strides=(1, 1), padding=((0, 0), (0, 0)),
        dimension_numbers=("NCHW", "OIHW", "NCHW"))
    y = bn(y3, bn3) + bn(y1, bn1)
    return y * jax.nn.sigmoid(y)


if __name__ == "__main__":
    N, C1, C2, H, W = 2, 4, 8, 16, 16

    key = jax.random.PRNGKey(0)
    k1, k2, k3, k4, k5, k6, k7, k8 = jax.random.split(key, 8)

    x = jax.random.normal(k1, (N, C1, H, W), dtype=jnp.float32)
    w3 = jax.random.normal(k2, (C2, C1, 3, 3), dtype=jnp.float32) * 0.1
    w1 = jax.random.normal(k3, (C2, C1, 1, 1), dtype=jnp.float32) * 0.1

    bn3 = dict(
        gamma=1.0 + 0.1 * jax.random.normal(k4, (C2,), dtype=jnp.float32),
        beta=0.1 * jax.random.normal(k5, (C2,), dtype=jnp.float32),
        mean=0.1 * jax.random.normal(k6, (C2,), dtype=jnp.float32),
        var=jnp.abs(jax.random.normal(k7, (C2,), dtype=jnp.float32)) + 0.5,
        eps=1e-5,
    )
    bn1 = dict(
        gamma=1.0 + 0.1 * jax.random.normal(k8, (C2,), dtype=jnp.float32),
        beta=jnp.zeros((C2,), dtype=jnp.float32),
        mean=jnp.zeros((C2,), dtype=jnp.float32),
        var=jnp.ones((C2,), dtype=jnp.float32),
        eps=1e-5,
    )

    ref = repconv_reference(x, w3, w1, bn3, bn1)

    # f32 path with TH=8 (two H-tiles: exercises the halo-window DMA with
    # t > 0); exact parity with the unfused eval-mode PyTorch reference.
    out_f32 = jax.block_until_ready(
        repconv_forward(x, w3, w1, bn3, bn1, compute_dtype=jnp.float32, tile_h=8))
    assert out_f32.shape == (N, C2, H, W), out_f32.shape
    assert jnp.allclose(out_f32, ref, atol=1e-4, rtol=1e-4), (
        float(jnp.max(jnp.abs(out_f32 - ref))))

    # default path: bf16 MXU operands, f32 accumulation + f32 bias/SiLU
    # epilogue, TH=16; loose tolerance reflects bf16 operand rounding.
    out_bf16 = jax.block_until_ready(repconv_forward(x, w3, w1, bn3, bn1))
    assert out_bf16.shape == (N, C2, H, W), out_bf16.shape
    assert float(jnp.max(jnp.abs(out_bf16 - ref))) < 0.2, (
        float(jnp.max(jnp.abs(out_bf16 - ref))))

    print("KERNEL_OK")
</pallas_src>

<mosaic_0001>
module attributes {stable_mosaic.version = 11 : i64} {
  func.func @probe(%arg0: memref<8x128xf32, #tpu.memory_space<vmem>>, %arg1: memref<8x128xf32, #tpu.memory_space<vmem>>) attributes {dimension_semantics = [], scalar_prefetch = 0 : i64, scratch_operands = 0 : i64, tpu.core_type = #tpu.core_type<tc>} {
    %c0 = arith.constant 0 : index
    %c0_0 = arith.constant 0 : index
    %0 = vector.load %arg0[%c0, %c0_0] : memref<8x128xf32, #tpu.memory_space<vmem>>, vector<8x128xf32>
    %c1_i32 = arith.constant 1 : i32
    %1 = tpu.dynamic_rotate %0 by %c1_i32 dim 0 : vector<8x128xf32>, i32 -> vector<8x128xf32>
    %c0_1 = arith.constant 0 : index
    %c0_2 = arith.constant 0 : index
    %2 = vector.load %arg1[%c0_1, %c0_2] : memref<8x128xf32, #tpu.memory_space<vmem>>, vector<8x128xf32>
    tpu.vector_store %arg1[%c0_1, %c0_2], %1 {strides = array<i32>} : memref<8x128xf32, #tpu.memory_space<vmem>>, vector<8x128xf32>,
    return
  }
}

</mosaic_0001>

<bundles_post_ra>
// kernel: tpu_custom_call.1
= control target key start
LH: loop header
LB: loop body
LE: loop exit
PB: predicated region body
PF: predicated region fallthrough
CT: control target
= control target key end

     0   :  { %6 = vsyncpa [#allocation3], 0  ;;  %s125_s0 = inlined_call_operand.hbm [shape: f32[8,128], index: 0, kind: input, shape index: {}]   ;;  %s126_s1 = inlined_call_operand.hbm [shape: f32[8,128], index: 1, kind: output, shape index: {}]  }
   0x1   :  { %7 = vsyncpa [#allocation4], 0  ;;  %s89_s6 = smov [#allocation2]   ;;  %s41_s10 = scalar_lea.hbm %s125_s0, 128 }
   0x2   :  { %s14_s7 = sshll.u32 %s89_s6, 4  ;;  %p42_p0 = scmp.ne.s32.totalorder %s125_s0, %s41_s10  ;;  %s15_s7 = int_to_ptr.vmem [resolvable:$true] %s14_s7 }
   0x3   :  { %p45_p1 = scmp.lt.u32.totalorder %s41_s10, %s125_s0 }
   0x5   :  { %p47_p2 = pnand %p45_p1, %p42_p0 }
   0x7   :  { %50 = shalt.err (!%p47_p2)
}
   0x8   :  { %s51_s15 = scalar_lea.vmem %s15_s7, 128  ;;  %p56_p4 = scmp.lt.s32.totalorder %s15_s7, %s15_s7 }
   0x9   :  { %p52_p3 = scmp.ne.s32.totalorder %s15_s7, %s51_s15  ;;  %p57_p5 = scmp.lt.s32.totalorder %s51_s15, %s51_s15 }
   0xb   :  { %p58_p6 = por %p57_p5, %p56_p4 }
   0xd   :  { %p59_p7 = pnand %p58_p6, %p52_p3 }
   0xf   :  { %62 = shalt.err (!%p59_p7)
}
  0x10   :  { %17 = dma.hbm_to_vmem [thread:$0]  %s125_s0, 128, %s15_s7, [#allocation3]  }
  0x11   :  { %85 = dma.done.wait [#allocation3], 128  }
  0x12   :  { %86 = vsyncadd [#allocation3], 4294967168  ;;  %s90_s18 = smov [#allocation5]   ;;  %v21_v0 = vld [vmem:[#allocation2] sm:$0xff] }
  0x13   :  { %s30_s19 = sshll.u32 %s90_s18, 4  ;;  %v22_v1 = vrot.slane %v21_v0, 7  ;;  %s31_s19 = int_to_ptr.vmem [resolvable:$true] %s30_s19 }
  0x14   :  { %s63_s20 = scalar_lea.vmem %s31_s19, 128  ;;  %p68_p9 = scmp.lt.s32.totalorder %s31_s19, %s31_s19 }
  0x15   :  { %23 = vst [vmem:[#allocation5] sm:$0xff] %v22_v1  ;;  %p64_p8 = scmp.ne.s32.totalorder %s31_s19, %s63_s20  ;;  %p69_p10 = scmp.lt.s32.totalorder %s63_s20, %s63_s20 }
  0x17   :  { %p70_p11 = por %p69_p10, %p68_p9 }
  0x19   :  { %p71_p12 = pnand %p70_p11, %p64_p8 }
  0x1b   :  { %74 = shalt.err (!%p71_p12)
}
  0x1c   :  { %s75_s23 = scalar_lea.hbm %s126_s1, 128 }
  0x1d   :  { %p76_p13 = scmp.ne.s32.totalorder %s126_s1, %s75_s23  ;;  %p79_p0 = scmp.lt.u32.totalorder %s75_s23, %s126_s1 }
  0x1f   :  { %p81_p1 = pnand %p79_p0, %p76_p13 }
  0x21   :  { %84 = shalt.err (!%p81_p1)
}
  0x22   :  { %33 = dma.vmem_to_hbm [thread:$0]  %s31_s19, 128, %s126_s1, [#allocation4]  }
  0x23   :  { %87 = dma.done.wait [#allocation4], 128  }
  0x24   :  { %88 = vsyncadd [#allocation4], 4294967168 }
  0x25   :  { %37 = vsyncpa [#allocation3], 1 }
  0x26   :  { %38 = vsyncpa [#allocation4], 1 }

</bundles_post_ra>
